<compile_context>
chip_gen: v6e
topology: v6e:2x2x1
jax: 0.10.0
libtpu: 0.0.40
codegen_flags: <defaults>
</compile_context>

<pallas_src>
import jax
import jax.numpy as jnp
from jax import lax
from jax.experimental import pallas as pl
from jax.experimental.pallas import tpu as pltpu

_CHUNK = 512  # lanes processed per inner iteration (bounds vreg live ranges)


def _round_up(n, m):
    return ((n + m - 1) // m) * m


def mlp_kernel(x_ref, w1_ref, b1_ref, w2_ref, b2_ref, w3_ref, b3_ref, o_ref):
    """One batch tile of the MLP in the [features, batch] (lane-dense) layout.

    x_ref : [2,  Bt]   features on sublanes, batch on lanes
    wN    : [out, in]  PyTorch-native weight layout
    bN    : [out, 1]
    o_ref : [2,  Bt]
    """
    bt = x_ref.shape[1]
    n_chunks = bt // _CHUNK  # static

    # Hoist weight / bias loads out of the chunk loop (once per grid step).
    w1 = w1_ref[...]
    b1 = b1_ref[...]
    w2 = w2_ref[...]
    b2 = b2_ref[...]
    w3 = w3_ref[...]
    b3 = b3_ref[...]

    def body(c, carry):
        start = pl.multiple_of(c * _CHUNK, _CHUNK)
        x = x_ref[:, pl.ds(start, _CHUNK)].astype(jnp.float32)      # [2,  C]

        # Layer 1 (in=2): two broadcast-FMAs — cheaper/safer than a K=2 matmul.
        h1 = jnp.maximum(
            w1[:, 0:1] * x[0:1, :] + w1[:, 1:2] * x[1:2, :] + b1, 0.0
        )                                                            # [16, C]

        # Layers 2 & 3 on the MXU; VPU only does bias-add + ReLU.
        h2 = jnp.maximum(
            jnp.dot(w2, h1, preferred_element_type=jnp.float32) + b2, 0.0
        )                                                            # [32, C]
        y = jnp.dot(w3, h2, preferred_element_type=jnp.float32) + b3  # [2, C]

        o_ref[:, pl.ds(start, _CHUNK)] = y.astype(o_ref.dtype)
        return carry

    lax.fori_loop(0, n_chunks, body, 0, unroll=(n_chunks <= 8))


def generator_forward(x, params, *, block_b=8192):
    """x: [B, 2] float32.  params: PyTorch-layout weights (see init_params)."""
    w1, b1 = params["w1"], params["b1"]
    w2, b2 = params["w2"], params["b2"]
    w3, b3 = params["w3"], params["b3"]

    B = x.shape[0]
    block_b = max(block_b, _CHUNK)

    # Tile size: as large as block_b allows, but derived from ceil(B / n_tiles)
    # so the remainder padding is < _CHUNK-ish rather than ~a full large tile.
    n_tiles = -(-B // block_b)
    bb = _round_up(-(-B // n_tiles), _CHUNK)
    b_pad = _round_up(B, bb)

    xt = x.T                                        # [2, B]  (one-time transpose)
    if b_pad != B:
        xt = jnp.pad(xt, ((0, 0), (0, b_pad - B)))  # zero-pad remainder columns

    grid = (b_pad // bb,)

    def const_spec(arr):
        # Full-array block, constant index_map -> stays resident in VMEM.
        return pl.BlockSpec(arr.shape, lambda i: (0, 0))

    out_t = pl.pallas_call(
        mlp_kernel,
        out_shape=jax.ShapeDtypeStruct((2, b_pad), jnp.float32),
        grid_spec=pltpu.PrefetchScalarGridSpec(
            num_scalar_prefetch=0,
            grid=grid,
            in_specs=[
                pl.BlockSpec((2, bb), lambda i: (0, i)),   # x tile (double-buffered)
                const_spec(w1), const_spec(b1),
                const_spec(w2), const_spec(b2),
                const_spec(w3), const_spec(b3),
            ],
            out_specs=pl.BlockSpec((2, bb), lambda i: (0, i)),
        ),
        compiler_params=pltpu.CompilerParams(
            dimension_semantics=("parallel",),      # megacore sharding hint (v7x)
            vmem_limit_bytes=32 * 1024 * 1024,      # ample: per-step footprint << 1 MiB
        ),
    )(xt, w1, b1, w2, b2, w3, b3)

    return out_t[:, :B].T                           # back to [B, 2]


def init_params(key):
    """Deterministic init mimicking nn.Linear default (uniform +-1/sqrt(fan_in)).
    Weights stored PyTorch-native as [out, in]; biases as [out, 1]."""
    ks = jax.random.split(key, 6)

    def linear(kw, kb, fan_in, fan_out):
        bound = 1.0 / jnp.sqrt(fan_in)
        w = jax.random.uniform(kw, (fan_out, fan_in), jnp.float32, -bound, bound)
        b = jax.random.uniform(kb, (fan_out, 1), jnp.float32, -bound, bound)
        return w, b

    w1, b1 = linear(ks[0], ks[1], 2, 16)
    w2, b2 = linear(ks[2], ks[3], 16, 32)
    w3, b3 = linear(ks[4], ks[5], 32, 2)
    return {"w1": w1, "b1": b1, "w2": w2, "b2": b2, "w3": w3, "b3": b3}


def reference_forward(x, p):
    h1 = jnp.maximum(x @ p["w1"].T + p["b1"][:, 0], 0.0)
    h2 = jnp.maximum(h1 @ p["w2"].T + p["b2"][:, 0], 0.0)
    return h2 @ p["w3"].T + p["b3"][:, 0]


if __name__ == "__main__":
    key = jax.random.PRNGKey(0)
    k_param, k_x = jax.random.split(key)

    params = init_params(k_param)
    B = 300                                              # not a multiple of 128 on purpose
    x = jax.random.normal(k_x, (B, 2), jnp.float32)

    # Default (large) block_b; the tile-size derivation clamps it to one
    # 512-lane tile for this small B, exercising padding + the inner chunk loop.
    out = generator_forward(x, params)
    out = jax.block_until_ready(out)

    ref = reference_forward(x, params)
    assert out.shape == (B, 2)
    assert jnp.allclose(out, ref, atol=1e-5, rtol=1e-5), "mismatch vs reference"

    print("KERNEL_OK")
</pallas_src>

<mosaic_0001>
module attributes {stable_mosaic.version = 11 : i64} {
  func.func @mlp_kernel(%arg0: i32, %arg1: memref<2x512xf32, #tpu.memory_space<vmem>>, %arg2: memref<16x2xf32, #tpu.memory_space<vmem>>, %arg3: memref<16x1xf32, #tpu.memory_space<vmem>>, %arg4: memref<32x16xf32, #tpu.memory_space<vmem>>, %arg5: memref<32x1xf32, #tpu.memory_space<vmem>>, %arg6: memref<2x32xf32, #tpu.memory_space<vmem>>, %arg7: memref<2x1xf32, #tpu.memory_space<vmem>>, %arg8: memref<2x512xf32, #tpu.memory_space<vmem>>) attributes {dimension_semantics = [#tpu.dimension_semantics<parallel>], iteration_bounds = array<i64: 1>, scalar_prefetch = 0 : i64, scratch_operands = 0 : i64, tpu.core_type = #tpu.core_type<tc>, window_params = [{transform_indices = @transform_0, window_bounds = array<i64: 2, 512>}, {pipeline_mode = #tpu.pipeline_mode<synchronous>, transform_indices = @transform_1, window_bounds = array<i64: 16, 2>}, {pipeline_mode = #tpu.pipeline_mode<synchronous>, transform_indices = @transform_2, window_bounds = array<i64: 16, 1>}, {pipeline_mode = #tpu.pipeline_mode<synchronous>, transform_indices = @transform_3, window_bounds = array<i64: 32, 16>}, {pipeline_mode = #tpu.pipeline_mode<synchronous>, transform_indices = @transform_4, window_bounds = array<i64: 32, 1>}, {pipeline_mode = #tpu.pipeline_mode<synchronous>, transform_indices = @transform_5, window_bounds = array<i64: 2, 32>}, {pipeline_mode = #tpu.pipeline_mode<synchronous>, transform_indices = @transform_6, window_bounds = array<i64: 2, 1>}, {transform_indices = @transform_7, window_bounds = array<i64: 2, 512>}]} {
    %c0 = arith.constant 0 : index
    %c0_0 = arith.constant 0 : index
    %0 = vector.load %arg2[%c0, %c0_0] : memref<16x2xf32, #tpu.memory_space<vmem>>, vector<16x2xf32>
    %c0_1 = arith.constant 0 : index
    %c0_2 = arith.constant 0 : index
    %1 = vector.load %arg3[%c0_1, %c0_2] : memref<16x1xf32, #tpu.memory_space<vmem>>, vector<16x1xf32>
    %c0_3 = arith.constant 0 : index
    %c0_4 = arith.constant 0 : index
    %2 = vector.load %arg4[%c0_3, %c0_4] : memref<32x16xf32, #tpu.memory_space<vmem>>, vector<32x16xf32>
    %c0_5 = arith.constant 0 : index
    %c0_6 = arith.constant 0 : index
    %3 = vector.load %arg5[%c0_5, %c0_6] : memref<32x1xf32, #tpu.memory_space<vmem>>, vector<32x1xf32>
    %c0_7 = arith.constant 0 : index
    %c0_8 = arith.constant 0 : index
    %4 = vector.load %arg6[%c0_7, %c0_8] : memref<2x32xf32, #tpu.memory_space<vmem>>, vector<2x32xf32>
    %c0_9 = arith.constant 0 : index
    %c0_10 = arith.constant 0 : index
    %5 = vector.load %arg7[%c0_9, %c0_10] : memref<2x1xf32, #tpu.memory_space<vmem>>, vector<2x1xf32>
    %c0_i32 = arith.constant 0 : i32
    %c512_i32 = arith.constant 512 : i32
    %6 = arith.muli %c0_i32, %c512_i32 : i32
    %7 = tpu.assume_multiple %6, 512 : i32
    %c0_11 = arith.constant 0 : index
    %8 = arith.index_cast %7 : i32 to index
    %9 = vector.load %arg1[%c0_11, %8] : memref<2x512xf32, #tpu.memory_space<vmem>>, vector<2x512xf32>
    %10 = vector.extract_strided_slice %0 {offsets = [0, 0], sizes = [16, 1], strides = [1, 1]} : vector<16x2xf32> to vector<16x1xf32>
    %11 = vector.extract_strided_slice %9 {offsets = [0, 0], sizes = [1, 512], strides = [1, 1]} : vector<2x512xf32> to vector<1x512xf32>
    %12 = vector.broadcast %10 : vector<16x1xf32> to vector<16x512xf32>
    %13 = vector.broadcast %11 : vector<1x512xf32> to vector<16x512xf32>
    %14 = arith.mulf %12, %13 : vector<16x512xf32>
    %15 = vector.extract_strided_slice %0 {offsets = [0, 1], sizes = [16, 1], strides = [1, 1]} : vector<16x2xf32> to vector<16x1xf32>
    %16 = vector.extract_strided_slice %9 {offsets = [1, 0], sizes = [1, 512], strides = [1, 1]} : vector<2x512xf32> to vector<1x512xf32>
    %17 = vector.broadcast %15 : vector<16x1xf32> to vector<16x512xf32>
    %18 = vector.broadcast %16 : vector<1x512xf32> to vector<16x512xf32>
    %19 = arith.mulf %17, %18 : vector<16x512xf32>
    %20 = arith.addf %14, %19 : vector<16x512xf32>
    %21 = vector.broadcast %1 : vector<16x1xf32> to vector<16x512xf32>
    %22 = arith.addf %20, %21 : vector<16x512xf32>
    %cst = arith.constant 0.000000e+00 : f32
    %23 = vector.broadcast %cst : f32 to vector<16x512xf32>
    %24 = arith.maximumf %22, %23 : vector<16x512xf32>
    %cst_12 = arith.constant dense<0.000000e+00> : vector<32x512xf32>
    %25 = tpu.matmul %2, %24, %cst_12 {dimension_numbers = #tpu.dot_dimension_numbers<[1], [0], [0], [1], [0, 0, 1, 1], [], []>} : vector<32x16xf32>, vector<16x512xf32>, vector<32x512xf32> -> vector<32x512xf32>
    %26 = vector.broadcast %3 : vector<32x1xf32> to vector<32x512xf32>
    %27 = arith.addf %25, %26 : vector<32x512xf32>
    %cst_13 = arith.constant 0.000000e+00 : f32
    %28 = vector.broadcast %cst_13 : f32 to vector<32x512xf32>
    %29 = arith.maximumf %27, %28 : vector<32x512xf32>
    %cst_14 = arith.constant dense<0.000000e+00> : vector<2x512xf32>
    %30 = tpu.matmul %4, %29, %cst_14 {dimension_numbers = #tpu.dot_dimension_numbers<[1], [0], [0], [1], [0, 0, 1, 1], [], []>} : vector<2x32xf32>, vector<32x512xf32>, vector<2x512xf32> -> vector<2x512xf32>
    %31 = vector.broadcast %5 : vector<2x1xf32> to vector<2x512xf32>
    %32 = arith.addf %30, %31 : vector<2x512xf32>
    %c0_15 = arith.constant 0 : index
    %33 = arith.index_cast %7 : i32 to index
    %34 = vector.load %arg8[%c0_15, %33] : memref<2x512xf32, #tpu.memory_space<vmem>>, vector<2x512xf32>
    tpu.vector_store %arg8[%c0_15, %33], %32 {strides = array<i32>} : memref<2x512xf32, #tpu.memory_space<vmem>>, vector<2x512xf32>,
    %c1_i32 = arith.constant 1 : i32
    return
  }
  func.func @transform_0(%arg0: i32) -> (i32, i32) {
    %c0_i32 = arith.constant 0 : i32
    %c0_i32_0 = arith.constant 0 : i32
    return %c0_i32, %arg0 : i32, i32
  }
  func.func @transform_1(%arg0: i32) -> (i32, i32) {
    %c0_i32 = arith.constant 0 : i32
    %c0_i32_0 = arith.constant 0 : i32
    %c0_i32_1 = arith.constant 0 : i32
    return %c0_i32, %c0_i32_0 : i32, i32
  }
  func.func @transform_2(%arg0: i32) -> (i32, i32) {
    %c0_i32 = arith.constant 0 : i32
    %c0_i32_0 = arith.constant 0 : i32
    %c0_i32_1 = arith.constant 0 : i32
    return %c0_i32, %c0_i32_0 : i32, i32
  }
  func.func @transform_3(%arg0: i32) -> (i32, i32) {
    %c0_i32 = arith.constant 0 : i32
    %c0_i32_0 = arith.constant 0 : i32
    %c0_i32_1 = arith.constant 0 : i32
    return %c0_i32, %c0_i32_0 : i32, i32
  }
  func.func @transform_4(%arg0: i32) -> (i32, i32) {
    %c0_i32 = arith.constant 0 : i32
    %c0_i32_0 = arith.constant 0 : i32
    %c0_i32_1 = arith.constant 0 : i32
    return %c0_i32, %c0_i32_0 : i32, i32
  }
  func.func @transform_5(%arg0: i32) -> (i32, i32) {
    %c0_i32 = arith.constant 0 : i32
    %c0_i32_0 = arith.constant 0 : i32
    %c0_i32_1 = arith.constant 0 : i32
    return %c0_i32, %c0_i32_0 : i32, i32
  }
  func.func @transform_6(%arg0: i32) -> (i32, i32) {
    %c0_i32 = arith.constant 0 : i32
    %c0_i32_0 = arith.constant 0 : i32
    %c0_i32_1 = arith.constant 0 : i32
    return %c0_i32, %c0_i32_0 : i32, i32
  }
  func.func @transform_7(%arg0: i32) -> (i32, i32) {
    %c0_i32 = arith.constant 0 : i32
    %c0_i32_0 = arith.constant 0 : i32
    return %c0_i32, %arg0 : i32, i32
  }
}

</mosaic_0001>

<bundles_post_ra>
// kernel: tpu_custom_call.1
= control target key start
LH: loop header
LB: loop body
LE: loop exit
PB: predicated region body
PF: predicated region fallthrough
CT: control target
= control target key end

     0   :  { %v641_v2 = vmov 0   ;;  %s763_s0 = inlined_call_operand.vmem [shape: f32[2,512], index: 0, kind: input, shape index: {}]   ;;  %s764_s1 = inlined_call_operand.vmem [shape: f32[16,2], index: 1, kind: input, shape index: {}]   ;;  %s765_s2 = inlined_call_operand.vmem [shape: f32[16,1], index: 2, kind: input, shape index: {}]   ;;  %s766_s3 = inlined_call_operand.vmem [shape: f32[32,16], index: 3, kind: input, shape index: {}]   ;;  %s767_s4 = inlined_call_operand.vmem [shape: f32[32,1], index: 4, kind: input, shape index: {}]   ;;  %s768_s5 = inlined_call_operand.vmem [shape: f32[2,32], index: 5, kind: input, shape index: {}]   ;;  %s769_s6 = inlined_call_operand.vmem [shape: f32[2,1], index: 6, kind: input, shape index: {}]   ;;  %s770_s7 = inlined_call_operand.hbm [shape: f32[2,512], index: 7, kind: output, shape index: {}]  }
   0x1   :  { %v28_v0 = vld [vmem:[%s764_s1 + $0x8] sm:$0xff]  ;;  %v27_v1 = vld [vmem:[%s764_s1] sm:$0xff]  ;;  %615 = vset.pattern.permute.xlu1 %v641_v2  ;;  %613 = vset.pattern.permute.xlu0 %v641_v2 }
   0x2   :  { %49 = vperm.xlu0 %613, %v28_v0   ;;  %44 = vperm.xlu1 %615, %v27_v1  }
   0x3   :  { %12 = vsyncpa [#allocation3], 0  ;;  %v642_v3 = vmov 1   ;;  %v29_v4 = vld [vmem:[%s765_s2] sm:$0xff]  ;;  %v30_v5 = vld [vmem:[%s765_s2 + $0x8] sm:$0xff]  ;;  %v643_v8 = vmov 0.0   ;;  %v53_v12 = vlaneseq }
   0x4   :  { %v36_v6 = vld [vmem:[%s767_s4 + $0x8] sm:$0xff]  ;;  %v38_v7 = vld [vmem:[%s767_s4 + $0x18] sm:$0xff]  ;;  %280 = vmatprep.mubr.f32.mxu0 %v643_v8  ;;  %369 = vmatprep.mubr.f32.mxu1 %v643_v8  ;;  %v40_v9 = vld [vmem:[%s769_s6] sm:$0x3]  ;;  %vm203_vm0 = vcmask 130048   ;;  %vm415_vm1 = vcmask 261120  }
   0x5   :  { %v37_v10 = vld [vmem:[%s767_s4 + $0x10] sm:$0xff]  ;;  %v35_v11 = vld [vmem:[%s767_s4] sm:$0xff]  ;;  %v715_v13 = vshrl.u32 %v53_v12, 7 }
   0x6   :  { %614 = vset.pattern.permute.xlu0 %v642_v3  ;;  %616 = vset.pattern.permute.xlu1 %v642_v3  ;;  %v41_v18 = vld [vmem:[%s763_s0] sm:$0xff] }
   0x7   :  { %102 = vperm.xlu0 %614, %v28_v0   ;;  %98 = vperm.xlu1 %616, %v27_v1   ;;  %v55_v14 = vsub.s32 0, %v715_v13  ;;  %v59_v15 = vsub.s32 2, %v715_v13  ;;  %v63_v16 = vsub.s32 4, %v715_v13  ;;  %v67_v17 = vsub.s32 6, %v715_v13 }
   0x8   :  { %v107_v19 = vsub.s32 1, %v715_v13  ;;  %v115_v20 = vsub.s32 5, %v715_v13  ;;  %v111_v21 = vsub.s32 3, %v715_v13  ;;  %v119_v22 = vsub.s32 7, %v715_v13 }
   0x9   :  { %v56_v23 = vrot.slane %v41_v18, %v55_v14  ;;  %v60_v24 = vrot.slane %v41_v18, %v59_v15  ;;  %v64_v25 = vrot.slane %v41_v18, %v63_v16  ;;  %v68_v26 = vrot.slane %v41_v18, %v67_v17 }
   0xa   :  { %v108_v27 = vrot.slane %v41_v18, %v107_v19  ;;  %v116_v28 = vrot.slane %v41_v18, %v115_v20  ;;  %v112_v29 = vrot.slane %v41_v18, %v111_v21  ;;  %v120_v30 = vrot.slane %v41_v18, %v119_v22 }
   0xb   :  { %618 = vset.pattern.permute.xlu0 %v641_v2  ;;  %617 = vset.pattern.permute.xlu1 %v641_v2  ;;  %v76_v31 = vrot.slane %v56_v23, %v55_v14  ;;  %v80_v32 = vrot.slane %v60_v24, %v55_v14  ;;  %v84_v33 = vrot.slane %v64_v25, %v55_v14  ;;  %v31_v23 = vld [vmem:[%s766_s3] sm:$0xff]  ;;  %v32_v24 = vld [vmem:[%s766_s3 + $0x8] sm:$0xff]  ;;  %v33_v25 = vld [vmem:[%s766_s3 + $0x10] sm:$0xff] }
   0xc   :  { %159 = vperm.xlu0 %618, %v29_v4   ;;  %164 = vperm.xlu1 %617, %v30_v5   ;;  %v88_v34 = vrot.slane %v68_v26, %v55_v14  ;;  %v128_v37 = vrot.slane %v108_v27, %v107_v19  ;;  %v136_v38 = vrot.slane %v116_v28, %v107_v19  ;;  %v34_v26 = vld [vmem:[%s766_s3 + $0x18] sm:$0xff] }
   0xd   :  { %v132_v39 = vrot.slane %v112_v29, %v107_v19  ;;  %v140_v40 = vrot.slane %v120_v30, %v107_v19 }
  0x10   :  { %190 = vperm.xlu0 %618, %v36_v6   ;;  %200 = vperm.xlu1 %617, %v38_v7  }
  0x14   :  { %412 = vperm.xlu0 %618, %v40_v9   ;;  %195 = vperm.xlu1 %617, %v37_v10  }
  0x18   :  { %185 = vperm.xlu1 %617, %v35_v11  }
  0x7d   :  { %v45_v35 = vpop.permute.xlu1 %44  ;;  %v50_v36 = vpop.permute.xlu0 %49 }
  0x7e   :  { %v89_v41 = vmul.f32 %v76_v31, %v45_v35  ;;  %v90_v42 = vmul.f32 %v80_v32, %v45_v35  ;;  %v91_v43 = vmul.f32 %v84_v33, %v45_v35  ;;  %v92_v44 = vmul.f32 %v88_v34, %v45_v35 }
  0x7f   :  { %v93_v45 = vmul.f32 %v76_v31, %v50_v36  ;;  %v95_v46 = vmul.f32 %v84_v33, %v50_v36  ;;  %v94_v49 = vmul.f32 %v80_v32, %v50_v36  ;;  %v96_v50 = vmul.f32 %v88_v34, %v50_v36 }
  0x82   :  { %v103_v47 = vpop.permute.xlu0 %102  ;;  %v99_v48 = vpop.permute.xlu1 %98 }
  0x83   :  { %v145_v51 = vmul.f32 %v128_v37, %v103_v47  ;;  %v147_v52 = vmul.f32 %v136_v38, %v103_v47  ;;  %v141_v53 = vmul.f32 %v128_v37, %v99_v48  ;;  %v142_v54 = vmul.f32 %v132_v39, %v99_v48 }
  0x84   :  { %v143_v55 = vmul.f32 %v136_v38, %v99_v48  ;;  %v144_v56 = vmul.f32 %v140_v40, %v99_v48  ;;  %v146_v57 = vmul.f32 %v132_v39, %v103_v47  ;;  %v148_v58 = vmul.f32 %v140_v40, %v103_v47 }
  0x85   :  { %v153_v59 = vadd.f32 %v145_v51, %v93_v45  ;;  %v155_v60 = vadd.f32 %v147_v52, %v95_v46  ;;  %v150_v61 = vadd.f32 %v142_v54, %v90_v42  ;;  %v149_v62 = vadd.f32 %v141_v53, %v89_v41 }
  0x86   :  { %v154_v63 = vadd.f32 %v146_v57, %v94_v49  ;;  %v156_v0 = vadd.f32 %v148_v58, %v96_v50  ;;  %v152_v1 = vadd.f32 %v144_v56, %v92_v44  ;;  %v151_v2 = vadd.f32 %v143_v55, %v91_v43 }
  0x87   :  { %v160_v3 = vpop.permute.xlu0 %159  ;;  %v165_v4 = vpop.permute.xlu1 %164 }
  0x88   :  { %v172_v5 = vadd.f32 %v165_v4, %v154_v63  ;;  %v174_v6 = vadd.f32 %v165_v4, %v156_v0  ;;  %v171_v7 = vadd.f32 %v165_v4, %v153_v59  ;;  %v173_v9 = vadd.f32 %v165_v4, %v155_v60 }
  0x89   :  { %v168_v10 = vadd.f32 %v160_v3, %v150_v61  ;;  %v170_v11 = vadd.f32 %v160_v3, %v152_v1  ;;  %v167_v12 = vadd.f32 %v160_v3, %v149_v62  ;;  %v169_v14 = vadd.f32 %v160_v3, %v151_v2 }
  0x8a   :  { %v180_v15 = vmax.f32 %v172_v5, 0.0  ;;  %v182_v16 = vmax.f32 %v174_v6, 0.0  ;;  %v179_v17 = vmax.f32 %v171_v7, 0.0  ;;  %v181_v18 = vmax.f32 %v173_v9, 0.0 }
  0x8b   :  { %v176_v19 = vmax.f32 %v168_v10, 0.0  ;;  %v178_v20 = vmax.f32 %v170_v11, 0.0  ;;  %v175_v21 = vmax.f32 %v167_v12, 0.0  ;;  %v177_v22 = vmax.f32 %v169_v14, 0.0  ;;  %v201_v33 = vpop.permute.xlu1 %200  ;;  %v191_v50 = vpop.permute.xlu0 %190 }
  0x8c   :  { %244 = vmatprep.subr.mxu0 %v180_v15  ;;  %333 = vmatprep.subr.mxu1 %v182_v16  ;;  %v39_v16 = vld [vmem:[%s768_s5] sm:$0x3]  ;;  %s645_s5 = smov [#allocation2]  }
  0x8d   :  { %245 = vmatpush1.msra.mxu0 %v179_v17  ;;  %334 = vmatpush1.msra.mxu1 %v181_v18  ;;  %v644_v17 = vmov 1983009808   ;;  %s590_s25 = sshll.u32 %s645_s5, 4  ;;  %s591_s25 = int_to_ptr.vmem [resolvable:$true] %s590_s25 }
  0x8e   :  { %246 = vmatprep.subr.mxu0 %v176_v19  ;;  %335 = vmatprep.subr.mxu1 %v178_v20  ;;  %v568_v18 = vunpack.c.l.s4 %v644_v17  ;;  %s619_s26 = scalar_lea.vmem %s591_s25, 128  ;;  %p624_p1 = scmp.lt.s32.totalorder %s591_s25, %s591_s25 }
  0x8f   :  { %247 = vmatpush1.msra.mxu0 %v175_v21  ;;  %336 = vmatpush1.msra.mxu1 %v177_v22  ;;  %v196_v40 = vpop.permute.xlu1 %195  ;;  %v413_v22 = vpop.permute.xlu0 %412  ;;  %p620_p0 = scmp.ne.s32.totalorder %s591_s25, %s619_s26  ;;  %p625_p2 = scmp.lt.s32.totalorder %s619_s26, %s619_s26 }
  0x90   :  { %598 = vmatmul.mubr.msk.f32.vlgmr.msra.gmra.mxu0 %vm203_vm0, %v31_v23  ;;  %602 = vmatmul.mubr.msk.f32.vlgmr.msra.gmra.mxu1 %vm203_vm0, %v31_v23  ;;  %v569_v19 = vunpack.c.0.s8 %v568_v18 }
  0x91   :  { %286 = vmatprep.mubr.f32.mxu0 %v643_v8  ;;  %375 = vmatprep.mubr.f32.mxu1 %v643_v8  ;;  %p626_p3 = por %p625_p2, %p624_p1 }
  0x93   :  { %v186_v57 = vpop.permute.xlu1 %185  ;;  %p627_p4 = pnand %p626_p3, %p620_p0 }
  0x94   :  { %599 = vmatmul.mubr.msk.f32.gmra.mxu0 %vm203_vm0, %v32_v24  ;;  %603 = vmatmul.mubr.msk.f32.gmra.mxu1 %vm203_vm0, %v32_v24 }
  0x95   :  { %292 = vmatprep.mubr.f32.mxu0 %v643_v8  ;;  %381 = vmatprep.mubr.f32.mxu1 %v643_v8 }
  0x98   :  { %600 = vmatmul.mubr.msk.f32.gmra.mxu0 %vm203_vm0, %v33_v25  ;;  %604 = vmatmul.mubr.msk.f32.gmra.mxu1 %vm203_vm0, %v33_v25  ;;  %v572_v25 = vsub.s32 %v569_v19, %v715_v13 }
  0x99   :  { %298 = vmatprep.mubr.f32.mxu0 %v643_v8  ;;  %387 = vmatprep.mubr.f32.mxu1 %v643_v8 }
  0x9c   :  { %601 = vmatmul.mubr.msk.f32.gmra.mxu0 %vm203_vm0, %v34_v26  ;;  %605 = vmatmul.mubr.msk.f32.gmra.mxu1 %vm203_vm0, %v34_v26 }
  0x9d   :  { %483 = vmatprep.mubr.f32.mxu0 %v643_v8  ;;  %554 = vmatprep.mubr.f32.mxu1 %v643_v8 }
 0x150   :  { %v282_v27 = vpop.f32.mrf.mxu0  ;;  %v371_v28 = vpop.f32.mrf.mxu1 }
 0x151   :  { %v283_v2 = vadd.f32 %v282_v27, %v186_v57  ;;  %v372_v3 = vadd.f32 %v371_v28, %v186_v57 }
 0x152   :  { %v284_v29 = vpop.f32.mrf.mxu0  ;;  %v373_v30 = vpop.f32.mrf.mxu1 }
 0x153   :  { %v285_v62 = vadd.f32 %v284_v29, %v186_v57  ;;  %v374_v63 = vadd.f32 %v373_v30, %v186_v57  ;;  %v394_v14 = vmax.f32 %v283_v2, 0.0  ;;  %v396_v15 = vmax.f32 %v372_v3, 0.0 }
 0x154   :  { %v288_v31 = vpop.f32.mrf.mxu0  ;;  %v377_v32 = vpop.f32.mrf.mxu1 }
 0x155   :  { %v289_v58 = vadd.f32 %v288_v31, %v191_v50  ;;  %v378_v59 = vadd.f32 %v377_v32, %v191_v50  ;;  %v395_v11 = vmax.f32 %v285_v62, 0.0  ;;  %v397_v12 = vmax.f32 %v374_v63, 0.0 }
 0x156   :  { %v290_v34 = vpop.f32.mrf.mxu0  ;;  %v379_v35 = vpop.f32.mrf.mxu1 }
 0x157   :  { %v291_v53 = vadd.f32 %v290_v34, %v191_v50  ;;  %v380_v54 = vadd.f32 %v379_v35, %v191_v50  ;;  %v398_v9 = vmax.f32 %v289_v58, 0.0  ;;  %v400_v10 = vmax.f32 %v378_v59, 0.0 }
 0x158   :  { %v294_v36 = vpop.f32.mrf.mxu0  ;;  %v383_v37 = vpop.f32.mrf.mxu1 }
 0x159   :  { %v295_v51 = vadd.f32 %v294_v36, %v196_v40  ;;  %v384_v52 = vadd.f32 %v383_v37, %v196_v40  ;;  %v399_v6 = vmax.f32 %v291_v53, 0.0  ;;  %v401_v7 = vmax.f32 %v380_v54, 0.0 }
 0x15a   :  { %v296_v38 = vpop.f32.mrf.mxu0  ;;  %v385_v39 = vpop.f32.mrf.mxu1 }
 0x15b   :  { %v297_v46 = vadd.f32 %v296_v38, %v196_v40  ;;  %v386_v47 = vadd.f32 %v385_v39, %v196_v40  ;;  %v402_v4 = vmax.f32 %v295_v51, 0.0  ;;  %v404_v5 = vmax.f32 %v384_v52, 0.0 }
 0x15c   :  { %v300_v41 = vpop.f32.mrf.mxu0  ;;  %v389_v42 = vpop.f32.mrf.mxu1 }
 0x15d   :  { %v301_v43 = vadd.f32 %v300_v41, %v201_v33  ;;  %v390_v44 = vadd.f32 %v389_v42, %v201_v33  ;;  %v403_v0 = vmax.f32 %v297_v46, 0.0  ;;  %v405_v1 = vmax.f32 %v386_v47, 0.0 }
 0x15e   :  { %v302_v45 = vpop.f32.mrf.mxu0  ;;  %v391_v8 = vpop.f32.mrf.mxu1 }
 0x15f   :  { %v303_v48 = vadd.f32 %v302_v45, %v201_v33  ;;  %v392_v49 = vadd.f32 %v391_v8, %v201_v33  ;;  %v406_v60 = vmax.f32 %v301_v43, 0.0  ;;  %v408_v61 = vmax.f32 %v390_v44, 0.0 }
 0x161   :  { %v407_v55 = vmax.f32 %v303_v48, 0.0  ;;  %v409_v56 = vmax.f32 %v392_v49, 0.0 }
 0x163   :  { %443 = vmatprep.subr.mxu0 %v407_v55  ;;  %514 = vmatprep.subr.mxu1 %v409_v56 }
 0x164   :  { %444 = vmatpush1.msra.mxu0 %v406_v60  ;;  %515 = vmatpush1.msra.mxu1 %v408_v61 }
 0x165   :  { %445 = vmatprep.subr.mxu0 %v403_v0  ;;  %516 = vmatprep.subr.mxu1 %v405_v1 }
 0x166   :  { %446 = vmatpush1.msra.mxu0 %v402_v4  ;;  %517 = vmatpush1.msra.mxu1 %v404_v5 }
 0x167   :  { %447 = vmatprep.subr.mxu0 %v399_v6  ;;  %518 = vmatprep.subr.mxu1 %v401_v7 }
 0x168   :  { %448 = vmatpush1.msra.mxu0 %v398_v9  ;;  %519 = vmatpush1.msra.mxu1 %v400_v10 }
 0x169   :  { %449 = vmatprep.subr.mxu0 %v395_v11  ;;  %520 = vmatprep.subr.mxu1 %v397_v12 }
 0x16a   :  { %450 = vmatpush1.msra.mxu0 %v394_v14  ;;  %521 = vmatpush1.msra.mxu1 %v396_v15 }
 0x16b   :  { %606 = vmatmul.mubr.msk.f32.vlgmr.msra.gmra.mxu0 %vm415_vm1, %v39_v16  ;;  %607 = vmatmul.mubr.msk.f32.vlgmr.msra.gmra.mxu1 %vm415_vm1, %v39_v16 }
 0x22b   :  { %v485_v20 = vpop.f32.mrf.mxu0  ;;  %v556_v21 = vpop.f32.mrf.mxu1 }
 0x22c   :  { %v486_v26 = vadd.f32 %v485_v20, %v413_v22  ;;  %v557_v27 = vadd.f32 %v556_v21, %v413_v22 }
 0x22d   :  { %v487_v23 = vpop.f32.mrf.mxu0  ;;  %v558_v24 = vpop.f32.mrf.mxu1 }
 0x22e   :  { %v488_v28 = vadd.f32 %v487_v23, %v413_v22  ;;  %v559_v29 = vadd.f32 %v558_v24, %v413_v22 }
 0x230   :  { %v565_v30 = vcombine.low %v486_v26, %v488_v28  ;;  %v566_v31 = vcombine.low %v557_v27, %v559_v29 }
 0x232   :  { %v573_v32 = vrot.slane %v565_v30, %v572_v25  ;;  %v580_v33 = vrot.slane %v566_v31, %v572_v25 }
 0x234   :  { %v581_v34 = vcombine.low %v573_v32, %v580_v33 }
 0x236   :  { %583 = vst [vmem:[#allocation2] sm:$0xff] %v581_v34 }
 0x237   :  { %630 = shalt.err (!%p627_p4)
}
 0x238   :  { %593 = dma.vmem_to_hbm [thread:$0]  %s591_s25, 128, %s770_s7, [#allocation3]  }
 0x239   :  { %639 = dma.done.wait [#allocation3], 128  }
 0x23a   :  { %640 = vsyncadd [#allocation3], 4294967168 }
 0x23b   :  { %597 = vsyncpa [#allocation3], 1 }

</bundles_post_ra>
